<compile_context>
chip_gen: v6e
topology: v6e:2x2x1
jax: 0.10.0
libtpu: 0.0.40
codegen_flags: <defaults>
</compile_context>

<pallas_src>
import functools

import jax
import jax.numpy as jnp
from jax.experimental import pallas as pl
from jax.experimental.pallas import tpu as pltpu


# ---------------------------------------------------------------------------
# Fused kernel
# ---------------------------------------------------------------------------
def _fused_conv_kernel(x_ref, a1_ref, s1_ref, a2_ref, s2_ref, a3_ref, s3_ref,
                       o_ref, *, H, W, C):
    """All three conv layers for one batch element.

    x_ref : (1, H, C*W)      activation, channels interleaved on the lane axis
    aK_ref: (C*W, k*C*W)     folded weight matrix of layer K (BN scale folded in)
    sK_ref: (1, C*W)         folded bias + BN shift of layer K
    o_ref : (1, H, C*W)      output activation (same layout as input)
    """
    OW = C * W

    def layer(xrow, acat, shift, k, act):
        pad = (k - 1) // 2
        # One MXU matmul: channel contraction + all horizontal (clamped) taps.
        # z[h, dh*OW + o*W + w] = sum_{i,dw} w[o,i,dh,dw] * x[i, h, clampW(w+dw-pad)]
        z = jnp.dot(xrow, acat, preferred_element_type=jnp.float32)  # (H, k*OW)
        # Vertical replication padding: prepend/append edge rows once.
        zp = jnp.concatenate(
            [z[0:1, :]] * pad + [z] + [z[H - 1:H, :]] * pad, axis=0)  # (H+2p, k*OW)
        # Sum the k vertically shifted tap blocks.
        acc = zp[0:H, 0:OW]
        for dh in range(1, k):
            acc = acc + zp[dh:dh + H, dh * OW:(dh + 1) * OW]
        y = acc + shift  # fused conv-bias + BN shift
        if act == "leaky_relu":
            y = jnp.where(y >= 0.0, y, 0.01 * y)   # PyTorch default slope 0.01
        elif act == "relu":
            y = jnp.maximum(y, 0.0)
        return y

    x = x_ref[0].astype(jnp.float32)                      # (H, C*W)
    y = layer(x, a1_ref[...], s1_ref[...], 5, "none")
    y = layer(y, a2_ref[...], s2_ref[...], 3, "leaky_relu")
    y = layer(y, a3_ref[...], s3_ref[...], 3, "relu")
    o_ref[0] = y.astype(o_ref.dtype)


# ---------------------------------------------------------------------------
# Parameter construction / folding (runs once, outside the kernel)
# ---------------------------------------------------------------------------
def _build_acat(w_oihw, W):
    """Fold channel contraction + horizontal clamped taps into one matrix.

    Acat[i*W + w_in, dh*C*W + o*W + w_out] =
        sum_dw w[o,i,dh,dw] * [w_in == clamp(w_out + dw - pad, 0, W-1)]
    """
    O, I, k, _ = w_oihw.shape
    pad = (k - 1) // 2
    w_out = jnp.arange(W)
    src = jnp.clip(w_out[None, :] + jnp.arange(k)[:, None] - pad, 0, W - 1)  # (k, W)
    sel = (jnp.arange(W)[None, :, None] == src[:, None, :]).astype(jnp.float32)  # (dw, w_in, w_out)
    A = jnp.einsum("oihd,dab->oihab", w_oihw, sel)        # (O, I, k, W_in, W_out)
    acat = jnp.transpose(A, (1, 3, 2, 0, 4)).reshape(I * W, k * O * W)
    return acat


def init_raw_params(key, channels):
    """PyTorch-like Conv2d default init (uniform +/- 1/sqrt(fan_in))."""
    def conv_init(k, cout, cin, ksz):
        kw, kb = jax.random.split(k)
        fan_in = cin * ksz * ksz
        bound = 1.0 / (fan_in ** 0.5)
        w = jax.random.uniform(kw, (cout, cin, ksz, ksz), jnp.float32, -bound, bound)
        b = jax.random.uniform(kb, (cout,), jnp.float32, -bound, bound)
        return w, b

    k1, k2, k3 = jax.random.split(key, 3)
    w1, b1 = conv_init(k1, channels, channels, 5)
    w2, b2 = conv_init(k2, channels, channels, 3)
    w3, b3 = conv_init(k3, channels, channels, 3)
    return {"w1": w1, "b1": b1, "w2": w2, "b2": b2, "w3": w3, "b3": b3}


def fold_params(raw, W):
    """Fold conv bias + eval-mode BN into the per-layer (Acat, shift) pair."""
    C = raw["b1"].shape[0]
    eps = 1e-5
    ones = jnp.ones((C,), jnp.float32)
    zeros = jnp.zeros((C,), jnp.float32)
    bn_scale = ones / jnp.sqrt(1.0 + eps)   # gamma=1, running_var=1
    bn_shift = zeros                        # beta=0, running_mean=0

    def fold(w, b, s, t):
        w_f = w * s[:, None, None, None]
        shift = jnp.repeat(b * s + t, W).reshape(1, C * W)
        return _build_acat(w_f, W), shift

    a1, s1 = fold(raw["w1"], raw["b1"], ones, zeros)       # layer 1: no BN
    a2, s2 = fold(raw["w2"], raw["b2"], bn_scale, bn_shift)
    a3, s3 = fold(raw["w3"], raw["b3"], bn_scale, bn_shift)
    return {"a1": a1, "s1": s1, "a2": a2, "s2": s2, "a3": a3, "s3": s3}


# ---------------------------------------------------------------------------
# Forward pass (public interface is NCHW, exactly like the PyTorch module)
# ---------------------------------------------------------------------------
@jax.jit
def conv_module_forward(x_nchw, params):
    N, C, H, W = x_nchw.shape
    OW = C * W
    # NCHW -> (N, H, C*W): channels interleaved on the minor (lane) axis.
    xrow = jnp.transpose(x_nchw, (0, 2, 1, 3)).reshape(N, H, OW)

    kern = functools.partial(_fused_conv_kernel, H=H, W=W, C=C)
    a1, s1 = params["a1"], params["s1"]
    a2, s2 = params["a2"], params["s2"]
    a3, s3 = params["a3"], params["s3"]

    out = pl.pallas_call(
        kern,
        out_shape=jax.ShapeDtypeStruct((N, H, OW), x_nchw.dtype),
        grid_spec=pltpu.PrefetchScalarGridSpec(
            num_scalar_prefetch=0,
            grid=(N,),
            in_specs=[
                pl.BlockSpec((1, H, OW), lambda n: (n, 0, 0)),
                pl.BlockSpec(a1.shape, lambda n: (0, 0)),
                pl.BlockSpec(s1.shape, lambda n: (0, 0)),
                pl.BlockSpec(a2.shape, lambda n: (0, 0)),
                pl.BlockSpec(s2.shape, lambda n: (0, 0)),
                pl.BlockSpec(a3.shape, lambda n: (0, 0)),
                pl.BlockSpec(s3.shape, lambda n: (0, 0)),
            ],
            out_specs=pl.BlockSpec((1, H, OW), lambda n: (n, 0, 0)),
        ),
        compiler_params=pltpu.CompilerParams(dimension_semantics=("parallel",)),
    )(xrow, a1, s1, a2, s2, a3, s3)

    return jnp.transpose(out.reshape(N, H, C, W), (0, 2, 1, 3))  # -> NCHW


# ---------------------------------------------------------------------------
# Pure-JAX reference (mirrors the PyTorch module, eval-mode BN)
# ---------------------------------------------------------------------------
def reference_forward(x, raw):
    eps = 1e-5

    def rpad(v, p):
        return jnp.pad(v, ((0, 0), (0, 0), (p, p), (p, p)), mode="edge")

    def conv(v, w, b):
        y = jax.lax.conv_general_dilated(
            v, w, (1, 1), "VALID",
            dimension_numbers=("NCHW", "OIHW", "NCHW"),
            precision=jax.lax.Precision.HIGHEST)
        return y + b[None, :, None, None]

    bn = 1.0 / jnp.sqrt(1.0 + eps)
    y = conv(rpad(x, 2), raw["w1"], raw["b1"])
    y = conv(rpad(y, 1), raw["w2"], raw["b2"]) * bn
    y = jnp.where(y >= 0, y, 0.01 * y)
    y = conv(rpad(y, 1), raw["w3"], raw["b3"]) * bn
    y = jnp.maximum(y, 0.0)
    return y


if __name__ == "__main__":
    key = jax.random.PRNGKey(0)
    pkey, xkey = jax.random.split(key)

    channels, batch, H, W = 4, 2, 16, 16

    raw = init_raw_params(pkey, channels)
    params = fold_params(raw, W)
    x = jax.random.normal(xkey, (batch, channels, H, W), dtype=jnp.float32)

    out = jax.block_until_ready(conv_module_forward(x, params))
    assert out.shape == (batch, channels, H, W), out.shape
    assert out.dtype == jnp.float32

    ref = jax.block_until_ready(reference_forward(x, raw))
    max_err = float(jnp.max(jnp.abs(out - ref)))
    assert max_err < 1e-3, f"mismatch vs reference: {max_err}"

    print("KERNEL_OK")
</pallas_src>

<mosaic_0001>
module attributes {stable_mosaic.version = 11 : i64} {
  func.func @_fused_conv_kernel(%arg0: i32, %arg1: memref<1x16x64xf32, #tpu.memory_space<vmem>>, %arg2: memref<64x320xf32, #tpu.memory_space<vmem>>, %arg3: memref<1x64xf32, #tpu.memory_space<vmem>>, %arg4: memref<64x192xf32, #tpu.memory_space<vmem>>, %arg5: memref<1x64xf32, #tpu.memory_space<vmem>>, %arg6: memref<64x192xf32, #tpu.memory_space<vmem>>, %arg7: memref<1x64xf32, #tpu.memory_space<vmem>>, %arg8: memref<1x16x64xf32, #tpu.memory_space<vmem>>) attributes {dimension_semantics = [#tpu.dimension_semantics<parallel>], iteration_bounds = array<i64: 2>, scalar_prefetch = 0 : i64, scratch_operands = 0 : i64, tpu.core_type = #tpu.core_type<tc>, window_params = [{transform_indices = @transform_0, window_bounds = array<i64: 1, 16, 64>}, {pipeline_mode = #tpu.pipeline_mode<synchronous>, transform_indices = @transform_1, window_bounds = array<i64: 64, 320>}, {pipeline_mode = #tpu.pipeline_mode<synchronous>, transform_indices = @transform_2, window_bounds = array<i64: 1, 64>}, {pipeline_mode = #tpu.pipeline_mode<synchronous>, transform_indices = @transform_3, window_bounds = array<i64: 64, 192>}, {pipeline_mode = #tpu.pipeline_mode<synchronous>, transform_indices = @transform_4, window_bounds = array<i64: 1, 64>}, {pipeline_mode = #tpu.pipeline_mode<synchronous>, transform_indices = @transform_5, window_bounds = array<i64: 64, 192>}, {pipeline_mode = #tpu.pipeline_mode<synchronous>, transform_indices = @transform_6, window_bounds = array<i64: 1, 64>}, {transform_indices = @transform_7, window_bounds = array<i64: 1, 16, 64>}]} {
    %c0 = arith.constant 0 : index
    %c0_0 = arith.constant 0 : index
    %c0_1 = arith.constant 0 : index
    %0 = vector.load %arg1[%c0, %c0_0, %c0_1] : memref<1x16x64xf32, #tpu.memory_space<vmem>>, vector<1x16x64xf32>
    %1 = vector.shape_cast %0 : vector<1x16x64xf32> to vector<16x64xf32>
    %c0_2 = arith.constant 0 : index
    %c0_3 = arith.constant 0 : index
    %2 = vector.load %arg2[%c0_2, %c0_3] : memref<64x320xf32, #tpu.memory_space<vmem>>, vector<64x320xf32>
    %c0_4 = arith.constant 0 : index
    %c0_5 = arith.constant 0 : index
    %3 = vector.load %arg3[%c0_4, %c0_5] : memref<1x64xf32, #tpu.memory_space<vmem>>, vector<1x64xf32>
    %cst = arith.constant dense<0.000000e+00> : vector<16x320xf32>
    %4 = tpu.matmul %1, %2, %cst {dimension_numbers = #tpu.dot_dimension_numbers<[1], [0], [0], [1], [0, 0, 1, 1], [], []>} : vector<16x64xf32>, vector<64x320xf32>, vector<16x320xf32> -> vector<16x320xf32>
    %5 = vector.extract_strided_slice %4 {offsets = [0, 0], sizes = [1, 320], strides = [1, 1]} : vector<16x320xf32> to vector<1x320xf32>
    %6 = vector.extract_strided_slice %4 {offsets = [15, 0], sizes = [1, 320], strides = [1, 1]} : vector<16x320xf32> to vector<1x320xf32>
    %7 = tpu.concatenate %5, %5, %4, %6, %6 in 0 : vector<1x320xf32>, vector<1x320xf32>, vector<16x320xf32>, vector<1x320xf32>, vector<1x320xf32> -> vector<20x320xf32>
    %8 = vector.extract_strided_slice %7 {offsets = [0, 0], sizes = [16, 64], strides = [1, 1]} : vector<20x320xf32> to vector<16x64xf32>
    %9 = vector.extract_strided_slice %7 {offsets = [1, 64], sizes = [16, 64], strides = [1, 1]} : vector<20x320xf32> to vector<16x64xf32>
    %10 = arith.addf %8, %9 : vector<16x64xf32>
    %11 = vector.extract_strided_slice %7 {offsets = [2, 128], sizes = [16, 64], strides = [1, 1]} : vector<20x320xf32> to vector<16x64xf32>
    %12 = arith.addf %10, %11 : vector<16x64xf32>
    %13 = vector.extract_strided_slice %7 {offsets = [3, 192], sizes = [16, 64], strides = [1, 1]} : vector<20x320xf32> to vector<16x64xf32>
    %14 = arith.addf %12, %13 : vector<16x64xf32>
    %15 = vector.extract_strided_slice %7 {offsets = [4, 256], sizes = [16, 64], strides = [1, 1]} : vector<20x320xf32> to vector<16x64xf32>
    %16 = arith.addf %14, %15 : vector<16x64xf32>
    %17 = vector.broadcast %3 : vector<1x64xf32> to vector<16x64xf32>
    %18 = arith.addf %16, %17 : vector<16x64xf32>
    %c0_6 = arith.constant 0 : index
    %c0_7 = arith.constant 0 : index
    %19 = vector.load %arg4[%c0_6, %c0_7] : memref<64x192xf32, #tpu.memory_space<vmem>>, vector<64x192xf32>
    %c0_8 = arith.constant 0 : index
    %c0_9 = arith.constant 0 : index
    %20 = vector.load %arg5[%c0_8, %c0_9] : memref<1x64xf32, #tpu.memory_space<vmem>>, vector<1x64xf32>
    %cst_10 = arith.constant dense<0.000000e+00> : vector<16x192xf32>
    %21 = tpu.matmul %18, %19, %cst_10 {dimension_numbers = #tpu.dot_dimension_numbers<[1], [0], [0], [1], [0, 0, 1, 1], [], []>} : vector<16x64xf32>, vector<64x192xf32>, vector<16x192xf32> -> vector<16x192xf32>
    %22 = vector.extract_strided_slice %21 {offsets = [0, 0], sizes = [1, 192], strides = [1, 1]} : vector<16x192xf32> to vector<1x192xf32>
    %23 = vector.extract_strided_slice %21 {offsets = [15, 0], sizes = [1, 192], strides = [1, 1]} : vector<16x192xf32> to vector<1x192xf32>
    %24 = tpu.concatenate %22, %21, %23 in 0 : vector<1x192xf32>, vector<16x192xf32>, vector<1x192xf32> -> vector<18x192xf32>
    %25 = vector.extract_strided_slice %24 {offsets = [0, 0], sizes = [16, 64], strides = [1, 1]} : vector<18x192xf32> to vector<16x64xf32>
    %26 = vector.extract_strided_slice %24 {offsets = [1, 64], sizes = [16, 64], strides = [1, 1]} : vector<18x192xf32> to vector<16x64xf32>
    %27 = arith.addf %25, %26 : vector<16x64xf32>
    %28 = vector.extract_strided_slice %24 {offsets = [2, 128], sizes = [16, 64], strides = [1, 1]} : vector<18x192xf32> to vector<16x64xf32>
    %29 = arith.addf %27, %28 : vector<16x64xf32>
    %30 = vector.broadcast %20 : vector<1x64xf32> to vector<16x64xf32>
    %31 = arith.addf %29, %30 : vector<16x64xf32>
    %cst_11 = arith.constant 0.000000e+00 : f32
    %32 = vector.broadcast %cst_11 : f32 to vector<16x64xf32>
    %33 = arith.cmpf oge, %31, %32 : vector<16x64xf32>
    %cst_12 = arith.constant 0.00999999977 : f32
    %34 = vector.broadcast %cst_12 : f32 to vector<16x64xf32>
    %35 = arith.mulf %34, %31 : vector<16x64xf32>
    %36 = arith.select %33, %31, %35 : vector<16x64xi1>, vector<16x64xf32>
    %c0_13 = arith.constant 0 : index
    %c0_14 = arith.constant 0 : index
    %37 = vector.load %arg6[%c0_13, %c0_14] : memref<64x192xf32, #tpu.memory_space<vmem>>, vector<64x192xf32>
    %c0_15 = arith.constant 0 : index
    %c0_16 = arith.constant 0 : index
    %38 = vector.load %arg7[%c0_15, %c0_16] : memref<1x64xf32, #tpu.memory_space<vmem>>, vector<1x64xf32>
    %cst_17 = arith.constant dense<0.000000e+00> : vector<16x192xf32>
    %39 = tpu.matmul %36, %37, %cst_17 {dimension_numbers = #tpu.dot_dimension_numbers<[1], [0], [0], [1], [0, 0, 1, 1], [], []>} : vector<16x64xf32>, vector<64x192xf32>, vector<16x192xf32> -> vector<16x192xf32>
    %40 = vector.extract_strided_slice %39 {offsets = [0, 0], sizes = [1, 192], strides = [1, 1]} : vector<16x192xf32> to vector<1x192xf32>
    %41 = vector.extract_strided_slice %39 {offsets = [15, 0], sizes = [1, 192], strides = [1, 1]} : vector<16x192xf32> to vector<1x192xf32>
    %42 = tpu.concatenate %40, %39, %41 in 0 : vector<1x192xf32>, vector<16x192xf32>, vector<1x192xf32> -> vector<18x192xf32>
    %43 = vector.extract_strided_slice %42 {offsets = [0, 0], sizes = [16, 64], strides = [1, 1]} : vector<18x192xf32> to vector<16x64xf32>
    %44 = vector.extract_strided_slice %42 {offsets = [1, 64], sizes = [16, 64], strides = [1, 1]} : vector<18x192xf32> to vector<16x64xf32>
    %45 = arith.addf %43, %44 : vector<16x64xf32>
    %46 = vector.extract_strided_slice %42 {offsets = [2, 128], sizes = [16, 64], strides = [1, 1]} : vector<18x192xf32> to vector<16x64xf32>
    %47 = arith.addf %45, %46 : vector<16x64xf32>
    %48 = vector.broadcast %38 : vector<1x64xf32> to vector<16x64xf32>
    %49 = arith.addf %47, %48 : vector<16x64xf32>
    %cst_18 = arith.constant 0.000000e+00 : f32
    %50 = vector.broadcast %cst_18 : f32 to vector<16x64xf32>
    %51 = arith.maximumf %49, %50 : vector<16x64xf32>
    %c0_19 = arith.constant 0 : index
    %c0_20 = arith.constant 0 : index
    %c0_21 = arith.constant 0 : index
    %52 = vector.load %arg8[%c0_19, %c0_20, %c0_21] : memref<1x16x64xf32, #tpu.memory_space<vmem>>, vector<1x16x64xf32>
    %53 = vector.shape_cast %52 : vector<1x16x64xf32> to vector<16x64xf32>
    %54 = vector.shape_cast %51 : vector<16x64xf32> to vector<1x16x64xf32>
    tpu.vector_store %arg8[%c0_19, %c0_20, %c0_21], %54 {strides = array<i32>} : memref<1x16x64xf32, #tpu.memory_space<vmem>>, vector<1x16x64xf32>,
    return
  }
  func.func @transform_0(%arg0: i32) -> (i32, i32, i32) {
    %c0_i32 = arith.constant 0 : i32
    %c0_i32_0 = arith.constant 0 : i32
    %c0_i32_1 = arith.constant 0 : i32
    return %arg0, %c0_i32, %c0_i32_0 : i32, i32, i32
  }
  func.func @transform_1(%arg0: i32) -> (i32, i32) {
    %c0_i32 = arith.constant 0 : i32
    %c0_i32_0 = arith.constant 0 : i32
    %c0_i32_1 = arith.constant 0 : i32
    return %c0_i32, %c0_i32_0 : i32, i32
  }
  func.func @transform_2(%arg0: i32) -> (i32, i32) {
    %c0_i32 = arith.constant 0 : i32
    %c0_i32_0 = arith.constant 0 : i32
    %c0_i32_1 = arith.constant 0 : i32
    return %c0_i32, %c0_i32_0 : i32, i32
  }
  func.func @transform_3(%arg0: i32) -> (i32, i32) {
    %c0_i32 = arith.constant 0 : i32
    %c0_i32_0 = arith.constant 0 : i32
    %c0_i32_1 = arith.constant 0 : i32
    return %c0_i32, %c0_i32_0 : i32, i32
  }
  func.func @transform_4(%arg0: i32) -> (i32, i32) {
    %c0_i32 = arith.constant 0 : i32
    %c0_i32_0 = arith.constant 0 : i32
    %c0_i32_1 = arith.constant 0 : i32
    return %c0_i32, %c0_i32_0 : i32, i32
  }
  func.func @transform_5(%arg0: i32) -> (i32, i32) {
    %c0_i32 = arith.constant 0 : i32
    %c0_i32_0 = arith.constant 0 : i32
    %c0_i32_1 = arith.constant 0 : i32
    return %c0_i32, %c0_i32_0 : i32, i32
  }
  func.func @transform_6(%arg0: i32) -> (i32, i32) {
    %c0_i32 = arith.constant 0 : i32
    %c0_i32_0 = arith.constant 0 : i32
    %c0_i32_1 = arith.constant 0 : i32
    return %c0_i32, %c0_i32_0 : i32, i32
  }
  func.func @transform_7(%arg0: i32) -> (i32, i32, i32) {
    %c0_i32 = arith.constant 0 : i32
    %c0_i32_0 = arith.constant 0 : i32
    %c0_i32_1 = arith.constant 0 : i32
    return %arg0, %c0_i32, %c0_i32_0 : i32, i32, i32
  }
}

</mosaic_0001>

<bundles_post_ra>
// kernel: conv_module_forward.1
= control target key start
LH: loop header
LB: loop body
LE: loop exit
PB: predicated region body
PF: predicated region fallthrough
CT: control target
= control target key end

     0   :  { %12 = vsyncpa [#allocation3], 0  ;;  %s1149_s24 = smov 0   ;;  %s1391_s0 = inlined_call_operand.vmem [shape: f32[2,16,64], index: 0, kind: input, shape index: {}]   ;;  %s1392_s1 = inlined_call_operand.vmem [shape: f32[64,320], index: 1, kind: input, shape index: {}]   ;;  %s1393_s2 = inlined_call_operand.vmem [shape: f32[1,64], index: 2, kind: input, shape index: {}]   ;;  %s1394_s3 = inlined_call_operand.vmem [shape: f32[64,192], index: 3, kind: input, shape index: {}]   ;;  %s1395_s4 = inlined_call_operand.vmem [shape: f32[1,64], index: 4, kind: input, shape index: {}]   ;;  %s1396_s5 = inlined_call_operand.hbm [shape: f32[64,192], index: 5, kind: input, shape index: {}]   ;;  %s1397_s6 = inlined_call_operand.vmem [shape: f32[1,64], index: 6, kind: input, shape index: {}]   ;;  %s1398_s7 = inlined_call_operand.vmem [shape: f32[2,16,64], index: 7, kind: output, shape index: {}]  }
   0x1 LB: > { %s988_s25 = sadd.s32 4294967295, %s1102_s24   ;;  %p990_p0 = scmp.ge.s32.totalorder %s1102_s24, 1  ;;  %s1102_s24 = sphi %s1149_s24, %s18_s24  }
   0x2   : > { %p201_p1 = scmp.lt.s32.totalorder %s1102_s24, 3  ;;  %s1104_s26 = smov [#allocation2]  }
   0x3   : > { %s225_s27 = sshll.u32 %s1104_s26, 4  ;;  %p1051_p3 = scmp.eq.s32.totalorder %s988_s25, 0  ;;  %s226_s27 = int_to_ptr.vmem [resolvable:$true] %s225_s27 }
   0x4   : > { %p1157_p2 = pnand %p990_p0, %p201_p1  ;;  %s1077_s29 = scalar_lea.vmem %s226_s27, 2048 }
   0x5   : > { %p1078_p7 = scmp.ne.s32.totalorder %s226_s27, %s1077_s29  ;;  %p1085_p10 = scmp.lt.s32.totalorder %s226_s27, %s226_s27 }
   0x6   : > { %p1047_p4 = pneg %p1157_p2  ;;  %p1086_p11 = scmp.lt.s32.totalorder %s1077_s29, %s1077_s29 }
   0x8   : > { %p1048_p5 = pnand %p1051_p3, %p1047_p4  ;;  %p1087_p12 = por %p1086_p11, %p1085_p10 }
   0xa   : > { %p1068_p6 = pneg %p1048_p5 }
   0xc   : > { %p1080_p8 = pnand %p1078_p7, %p1068_p6 }
   0xe   : > { %p1081_p9 = pneg %p1080_p8 }
  0x10   : > { %p1088_p13 = pnand %p1087_p12, %p1081_p9 }
  0x12   : > { %1091 = shalt.err (!%p1088_p13)
}
  0x13   : > { %s1105_s30 = smov 256   ;;  %s1106_s8 = smov 16  }
  0x14   : > { %1050 = dma.hbm_to_vmem [thread:$0]  (!%p1048_p5), %s1396_s5, 2048, %s226_s27, [#allocation3], %s1105_s30, %s1105_s30, %s1106_s8  }
  0x15   : > { %252 = sbr.rel (%p1157_p2) target bundleno = 1027 (0x403), region = 48 }
  0x1a   : > { %1097 = dma.done.wait (%p1051_p3), [#allocation3], 2048  }
  0x1b   : > { %1099 = vsyncadd (%p1051_p3), [#allocation3], 4294965248  ;;  %p284_p0 = scmp.lt.s32.totalorder %s988_s25, 1  ;;  %v1107_v0 = vmov 0.0   ;;  %v318_v1 = vld [vmem:[%s1392_s1 + $0xb0] sm:$0xff]  ;;  %v317_v2 = vld [vmem:[%s1392_s1 + $0xa8] sm:$0xff] }
  0x1c   : > { %392 = vmatprep.mubr.f32.mxu0 %v1107_v0  ;;  %v315_v3 = vld [vmem:[%s1392_s1 + $0x98] sm:$0xff]  ;;  %344 = vmatprep.subr.mxu0 %v318_v1  ;;  %v314_v4 = vld [vmem:[%s1392_s1 + $0x90] sm:$0xff]  ;;  %v312_v5 = vld [vmem:[%s1392_s1 + $0x80] sm:$0xff]  ;;  %vm321_vm0 = vcmask 523264   ;;  %vm521_vm1 = vcmask 1040384   ;;  %vm492_vm2 = vcmask 1041408  }
  0x1d   : > { %s1401_s25 = smov (!%p284_p0, %s988_s25), 1  ;;  %345 = vmatpush1.msra.mxu0 %v317_v2  ;;  %v311_v6 = vld [vmem:[%s1392_s1 + $0x78] sm:$0xff]  ;;  %v309_v7 = vld [vmem:[%s1392_s1 + $0x68] sm:$0xff]  ;;  %v308_v8 = vld [vmem:[%s1392_s1 + $0x60] sm:$0xff]  ;;  %vm531_vm3 = vcmask 1042432   ;;  %vm537_vm4 = vcmask 1046528  }
  0x1e   : > { %s1012_s11 = sshll.u32 %s1401_s25, 4  ;;  %346 = vmatprep.subr.mxu0 %v315_v3  ;;  %v306_v10 = vld [vmem:[%s1392_s1 + $0x50] sm:$0xff]  ;;  %v319_v11 = vld [vmem:[%s1392_s1 + $0xb8] sm:$0xff]  ;;  %v316_v12 = vld [vmem:[%s1392_s1 + $0xa0] sm:$0xff]  ;;  %vm563_vm5 = vcmask 1044480   ;;  %vm553_vm6 = vcmask 1045504  }
  0x1f   : > { %s1195_s26 = scalar_lea.vmem %s1391_s0, %s1012_s11  ;;  %347 = vmatpush1.msra.mxu0 %v314_v4  ;;  %v305_v13 = vld [vmem:[%s1392_s1 + $0x48] sm:$0xff]  ;;  %1024 = vmatprep.subr.mxu1 %v319_v11  ;;  %v303_v14 = vld [vmem:[%s1392_s1 + $0x38] sm:$0xff]  ;;  %v302_v16 = vld [vmem:[%s1392_s1 + $0x30] sm:$0xff]  ;;  %s1108_s16 = smov 64   ;;  %vm579_vm7 = vcmask 1043456  }
  0x20   : > { %348 = vmatprep.subr.mxu0 %v312_v5  ;;  %v294_v9 = vld [vmem:[%s1195_s26] sm:$0xff]  ;;  %1025 = vmatpush3.msra.mxu1 %v319_v11  ;;  %v313_v15 = vld [vmem:[%s1392_s1 + $0x88] sm:$0xff]  ;;  %v310_v18 = vld [vmem:[%s1392_s1 + $0x70] sm:$0xff]  ;;  %s293_s28 = scalar_lea.vmem %s1398_s7, %s1012_s11 }
  0x21   : > { %349 = vmatpush1.msra.mxu0 %v311_v6  ;;  %1040 = vmatprep.mubr.msk.f32.mxu1 %vm321_vm0, %v294_v9  ;;  %v300_v17 = vld [vmem:[%s1392_s1 + $0x20] sm:$0xff]  ;;  %v299_v19 = vld [vmem:[%s1392_s1 + $0x18] sm:$0xff]  ;;  %v297_v20 = vld [vmem:[%s1392_s1 + $0x8] sm:$0xff] }
  0x22   : > { %350 = vmatprep.subr.mxu0 %v309_v7  ;;  %1026 = vmatprep.subr.mxu1 %v316_v12  ;;  %v307_v21 = vld [vmem:[%s1392_s1 + $0x58] sm:$0xff]  ;;  %v296_v22 = vld [vmem:[%s1392_s1] sm:$0xff]  ;;  %v301_v24 = vld [vmem:[%s1392_s1 + $0x28] sm:$0xff] }
  0x23   : > { %351 = vmatpush1.msra.mxu0 %v308_v8  ;;  %1027 = vmatpush3.msra.mxu1 %v316_v12  ;;  %v304_v23 = vld [vmem:[%s1392_s1 + $0x40] sm:$0xff]  ;;  %v295_v25 = vld [vmem:[%s1195_s26 + $0x8] sm:$0xff]  ;;  %v298_v26 = vld [vmem:[%s1392_s1 + $0x10] sm:$0xff] }
  0x24   : > { %352 = vmatprep.subr.mxu0 %v306_v10  ;;  %1028 = vmatprep.subr.mxu1 %v313_v15  ;;  %v612_v27 = vld [vmem:[%s1394_s3 + $0x78] sm:$0xff]  ;;  %v611_v28 = vld [vmem:[%s1394_s3 + $0x70] sm:$0xff]  ;;  %v610_v29 = vld [vmem:[%s1394_s3 + $0x68] sm:$0xff] }
  0x25   : > { %353 = vmatpush1.msra.mxu0 %v305_v13  ;;  %1029 = vmatpush3.msra.mxu1 %v313_v15  ;;  %v609_v30 = vld [vmem:[%s1394_s3 + $0x60] sm:$0xff]  ;;  %v608_v31 = vld [vmem:[%s1394_s3 + $0x58] sm:$0xff]  ;;  %v607_v32 = vld [vmem:[%s1394_s3 + $0x50] sm:$0xff] }
  0x26   : > { %354 = vmatprep.subr.mxu0 %v303_v14  ;;  %1030 = vmatprep.subr.mxu1 %v310_v18  ;;  %v606_v33 = vld [vmem:[%s1394_s3 + $0x48] sm:$0xff]  ;;  %v605_v34 = vld [vmem:[%s1394_s3 + $0x40] sm:$0xff]  ;;  %v604_v36 = vld [vmem:[%s1394_s3 + $0x38] sm:$0xff] }
  0x27   : > { %355 = vmatpush1.msra.mxu0 %v302_v16  ;;  %1031 = vmatpush3.msra.mxu1 %v310_v18  ;;  %v603_v39 = vld [vmem:[%s1394_s3 + $0x30] sm:$0xff]  ;;  %v602_v41 = vld [vmem:[%s1394_s3 + $0x28] sm:$0xff]  ;;  %v601_v45 = vld [vmem:[%s1394_s3 + $0x20] sm:$0xff] }
  0x28   : > { %356 = vmatprep.subr.mxu0 %v300_v17  ;;  %1032 = vmatprep.subr.mxu1 %v307_v21  ;;  %v600_v52 = vld [vmem:[%s1394_s3 + $0x18] sm:$0xff]  ;;  %v599_v56 = vld [vmem:[%s1394_s3 + $0x10] sm:$0xff]  ;;  %v598_v60 = vld [vmem:[%s1394_s3 + $0x8] sm:$0xff] }
  0x29   : > { %357 = vmatpush1.msra.mxu0 %v299_v19  ;;  %1033 = vmatpush3.msra.mxu1 %v307_v21  ;;  %v597_v2 = vld [vmem:[%s1394_s3] sm:$0xff] }
  0x2a   : > { %358 = vmatprep.subr.mxu0 %v297_v20  ;;  %1034 = vmatprep.subr.mxu1 %v304_v23 }
  0x2b   : > { %359 = vmatpush1.msra.mxu0 %v296_v22  ;;  %1035 = vmatpush3.msra.mxu1 %v304_v23 }
  0x2c   : > { %999 = vmatmul.mubr.msk.f32.vlgmr.msra.gmra.mxu0 %vm321_vm0, %v294_v9  ;;  %1036 = vmatprep.subr.mxu1 %v301_v24 }
  0x2d   : > { %398 = vmatprep.mubr.f32.mxu0 %v1107_v0  ;;  %1037 = vmatpush3.msra.mxu1 %v301_v24 }
  0x2e   : > { %1038 = vmatprep.subr.mxu1 %v298_v26  ;;  %636 = vmatprep.subr.mxu0 %v612_v27 }
  0x2f   : > { %1039 = vmatpush3.msra.mxu1 %v298_v26  ;;  %637 = vmatpush1.msra.mxu0 %v611_v28 }
  0x30   : > { %1000 = vmatmul.mubr.msk.f32.gmra.mxu0 %vm321_vm0, %v295_v25  ;;  %1041 = vmatmul.mubr.msk.f32.vlgmr.msra.gmra.mxu1 %vm321_vm0, %v295_v25 }
  0x31   : > { %684 = vmatprep.mubr.f32.mxu0 %v1107_v0  ;;  %847 = vmatprep.mubr.f32.mxu1 %v1107_v0 }
  0x32   : > { %638 = vmatprep.subr.mxu0 %v610_v29 }
  0x33   : > { %639 = vmatpush1.msra.mxu0 %v609_v30 }
  0x34   : > { %640 = vmatprep.subr.mxu0 %v608_v31 }
  0x35   : > { %641 = vmatpush1.msra.mxu0 %v607_v32 }
  0x36   : > { %642 = vmatprep.subr.mxu0 %v606_v33 }
  0x37   : > { %643 = vmatpush1.msra.mxu0 %v605_v34 }
  0x38   : > { %644 = vmatprep.subr.mxu0 %v604_v36 }
  0x39   : > { %645 = vmatpush1.msra.mxu0 %v603_v39 }
  0x3a   : > { %646 = vmatprep.subr.mxu0 %v602_v41 }
  0x3b   : > { %647 = vmatpush1.msra.mxu0 %v601_v45 }
  0x3c   : > { %648 = vmatprep.subr.mxu0 %v600_v52  ;;  %v774_v52 = vld [vmem:[#allocation2 + $0x70] sm:$0xff] }
  0x3d   : > { %649 = vmatpush1.msra.mxu0 %v599_v56  ;;  %v770_v56 = vld [vmem:[#allocation2 + $0x50] sm:$0xff] }
  0x3e   : > { %650 = vmatprep.subr.mxu0 %v598_v60 }
  0x3f   : > { %651 = vmatpush1.msra.mxu0 %v597_v2  ;;  %v764_v2 = vld [vmem:[#allocation2 + $0x20] sm:$0xff] }
  0xec   : > { %v394_v35 = vpop.f32.mrf.mxu0 }
  0xed   : > { %v483_v37 = vrot.slane %v394_v35, 7  ;;  %v493_v38 = vrot.slane %v394_v35, 6 }
  0xee   : > { %v396_v40 = vpop.f32.mrf.mxu0 }
  0xef   : > { %v522_v42 = vsel %vm521_vm1, %v394_v35, %v483_v37  ;;  %v484_v43 = vrot.slane %v396_v40, 7  ;;  %v494_v44 = vrot.slane %v396_v40, 6 }
  0xf0   : > { %v1301_v46 = vsel %vm492_vm2, %v522_v42, %v493_v38  ;;  %v400_v47 = vpop.f32.mrf.mxu0  ;;  %v1042_v55 = vpop.f32.mrf.mxu1  ;;  %v1003_v42 = vld [vmem:[%s1393_s2] ss:$0 sm:$0xff] }
  0xf1   : > { %v523_v48 = vsel %vm521_vm1, %v396_v40, %v484_v43  ;;  %v496_v49 = vrot.slane %v400_v47, 6  ;;  %v509_v50 = vrot.slane %v400_v47, 5  ;;  %v515_v51 = vrot.slane %v400_v47, 4 }
  0xf2   : > { %v526_v53 = vsel %vm492_vm2, %v523_v48, %v494_v44  ;;  %v402_v54 = vpop.f32.mrf.mxu0  ;;  %v538_v63 = vrot.slane %v1301_v46, 1  ;;  %v471_v7 = vpop.f32.mrf.mxu1  ;;  %v500_v11 = vrot.slane %v1042_v55, 6  ;;  %v511_v15 = vrot.slane %v1042_v55, 5 }
  0xf3   : > { %v528_v57 = vsel %vm492_vm2, %v496_v49, %v509_v50  ;;  %v498_v58 = vrot.slane %v402_v54, 6  ;;  %v510_v59 = vrot.slane %v402_v54, 5  ;;  %v516_v61 = vrot.slane %v402_v54, 4  ;;  %v772_v54 = vld [vmem:[#allocation2 + $0x60] sm:$0xff] }
  0xf4   : > { %v497_v62 = vsel %vm492_vm2, %v493_v38, %v496_v49  ;;  %v532_v1 = vsel %vm531_vm3, %v528_v57, %v515_v51  ;;  %v564_v6 = vrot.slane %v526_v53, 3  ;;  %v554_v12 = vrot.slane %v526_v53, 2  ;;  %v775_v51 = vld [vmem:[#allocation2 + $0x78] sm:$0xff]  ;;  %v773_v53 = vld [vmem:[#allocation2 + $0x68] sm:$0xff] }
  0xf5   : > { %v529_v3 = vsel %vm492_vm2, %v498_v58, %v510_v59  ;;  %v539_v4 = vrot.slane %v497_v62, 1  ;;  %v499_v5 = vsel %vm492_vm2, %v494_v44, %v498_v58  ;;  %v541_v14 = vrot.slane %v532_v1, 1  ;;  %799 = vmatprep.subr.mxu1 %v775_v51  ;;  %v769_v57 = vld [vmem:[#allocation2 + $0x48] sm:$0xff]  ;;  %v768_v58 = vld [vmem:[#allocation2 + $0x40] sm:$0xff]  ;;  %v767_v59 = vld [vmem:[#allocation2 + $0x38] sm:$0xff] }
  0xf6   : > { %v565_v8 = vrot.slane %v499_v5, 3  ;;  %v555_v9 = vrot.slane %v499_v5, 2  ;;  %v533_v10 = vsel %vm531_vm3, %v529_v3, %v516_v61  ;;  %v517_v18 = vrot.slane %v1042_v55, 4  ;;  %800 = vmatpush1.msra.mxu1 %v774_v52  ;;  %v771_v55 = vld [vmem:[#allocation2 + $0x58] sm:$0xff]  ;;  %v766_v61 = vld [vmem:[#allocation2 + $0x30] sm:$0xff] }
  0xf7   : > { %v540_v13 = vsel %vm537_vm4, %v538_v63, %v539_v4  ;;  %v567_v17 = vrot.slane %v533_v10, 3  ;;  %v495_v19 = vrot.slane %v471_v7, 6  ;;  %v530_v20 = vsel %vm492_vm2, %v500_v11, %v511_v15  ;;  %801 = vmatprep.subr.mxu1 %v773_v53  ;;  %v765_v63 = vld [vmem:[#allocation2 + $0x28] sm:$0xff]  ;;  %v763_v3 = vld [vmem:[#allocation2 + $0x18] sm:$0xff]  ;;  %v762_v5 = vld [vmem:[#allocation2 + $0x10] sm:$0xff] }
  0xf8   : > { %543 = vrot.lane.b32.xlu0 %v540_v13, %s1108_s16  ;;  %v566_v16 = vsel %vm563_vm5, %v564_v6, %v565_v8  ;;  %v556_v21 = vsel %vm553_vm6, %v554_v12, %v555_v9  ;;  %v557_v22 = vrot.slane %v533_v10, 2  ;;  %v534_v23 = vsel %vm531_vm3, %v530_v20, %v517_v18  ;;  %802 = vmatpush1.msra.mxu1 %v772_v54  ;;  %v761_v6 = vld [vmem:[#allocation2 + $0x8] sm:$0xff] }
  0xf9   : > { %569 = vrot.lane.b32.xlu1 %v566_v16, %s1108_s16  ;;  %v501_v24 = vsel %vm492_vm2, %v495_v19, %v500_v11  ;;  %v542_v25 = vsel %vm537_vm4, %v539_v4, %v541_v14  ;;  %v583_v27 = vrot.slane %v534_v23, 4  ;;  %v568_v29 = vsel %vm563_vm5, %v565_v8, %v567_v17  ;;  %803 = vmatprep.subr.mxu1 %v771_v55 }
  0xfa   : > { %v581_v26 = vrot.slane %v501_v24, 4  ;;  %v558_v28 = vsel %vm553_vm6, %v555_v9, %v557_v22  ;;  %v485_v31 = vrot.slane %v471_v7, 7  ;;  %804 = vmatpush1.msra.mxu1 %v770_v56 }
  0xfb   : > { %805 = vmatprep.subr.mxu1 %v769_v57 }
  0xfc   : > { %545 = vrot.lane.b32.xlu0 %v542_v25, %s1108_s16  ;;  %v584_v30 = vsel %vm579_vm7, %v581_v26, %v583_v27  ;;  %v524_v32 = vsel %vm521_vm1, %v471_v7, %v485_v31  ;;  %806 = vmatpush1.msra.mxu1 %v768_v58  ;;  %v760_v7 = vld [vmem:[#allocation2] sm:$0xff] }
  0xfd   : > { %571 = vrot.lane.b32.xlu1 %v568_v29, %s1108_s16  ;;  %v527_v33 = vsel %vm492_vm2, %v524_v32, %v495_v19  ;;  %807 = vmatprep.subr.mxu1 %v767_v59  ;;  %v1006_v32 = vld [vmem:[%s1395_s4] ss:$0 sm:$0xff] }
  0xfe   : > { %v580_v36 = vrot.slane %v527_v33, 4  ;;  %808 = vmatpush1.msra.mxu1 %v766_v61 }
  0xff   : > { %809 = vmatprep.subr.mxu1 %v765_v63 }
 0x100   : > { %v582_v43 = vsel %vm579_vm7, %v580_v36, %v581_v26  ;;  %810 = vmatpush1.msra.mxu1 %v764_v2 }
 0x101   : > { %811 = vmatprep.subr.mxu1 %v763_v3 }
 0x102   : > { %812 = vmatpush1.msra.mxu1 %v762_v5 }
 0x103   : > { %813 = vmatprep.subr.mxu1 %v761_v6 }
 0x104   : > { %814 = vmatpush1.msra.mxu1 %v760_v7  ;;  %v1009_v7 = vld [vmem:[%s1397_s6] ss:$0 sm:$0xff] }
 0x16a   : > { %v544_v34 = vpop.permute.xlu0 %543 }
 0x16b   : > { %v549_v35 = vadd.f32 %v544_v34, %v1301_v46  ;;  %v570_v37 = vpop.permute.xlu1 %569 }
 0x16d   : > { %v561_v38 = vadd.f32 %v556_v21, %v549_v35 }
 0x16e   : > { %v546_v39 = vpop.permute.xlu0 %545 }
 0x16f   : > { %v575_v40 = vadd.f32 %v570_v37, %v561_v38  ;;  %v550_v41 = vadd.f32 %v546_v39, %v497_v62  ;;  %v572_v47 = vpop.permute.xlu1 %571 }
 0x171   : > { %v587_v44 = vadd.f32 %v582_v43, %v575_v40  ;;  %v562_v45 = vadd.f32 %v558_v28, %v550_v41 }
 0x173   : > { %v595_v48 = vadd.f32 %v1003_v42, %v587_v44  ;;  %v576_v49 = vadd.f32 %v572_v47, %v562_v45 }
 0x175   : > { %v588_v50 = vadd.f32 %v584_v30, %v576_v49  ;;  %1004 = vmatmul.mubr.msk.f32.vlgmr.msra.gmra.mxu0 %vm321_vm0, %v595_v48 }
 0x176   : > { %690 = vmatprep.mubr.f32.mxu0 %v1107_v0 }
 0x177   : > { %v596_v46 = vadd.f32 %v1003_v42, %v588_v50 }
 0x179   : > { %1005 = vmatmul.mubr.msk.f32.gmra.mxu0 %vm321_vm0, %v596_v46 }
 0x235   : > { %v686_v60 = vpop.f32.mrf.mxu0 }
 0x236   : > { %v701_v62 = vrot.slane %v686_v60, 7 }
 0x237   : > { %v688_v1 = vpop.f32.mrf.mxu0 }
 0x238   : > { %v716_v8 = vsel %vm521_vm1, %v686_v60, %v701_v62  ;;  %v702_v21 = vrot.slane %v688_v1, 7 }
 0x239   : > { %v692_v4 = vpop.f32.mrf.mxu0  ;;  %v722_v13 = vrot.slane %v716_v8, 1 }
 0x23a   : > { %v703_v9 = vrot.slane %v692_v4, 7  ;;  %v712_v10 = vrot.slane %v692_v4, 6  ;;  %v717_v24 = vsel %vm521_vm1, %v688_v1, %v702_v21 }
 0x23b   : > { %v694_v18 = vpop.f32.mrf.mxu0  ;;  %v737_v27 = vrot.slane %v717_v24, 2 }
 0x23c   : > { %v704_v11 = vsel %vm521_vm1, %v701_v62, %v703_v9  ;;  %v718_v12 = vsel %vm521_vm1, %v703_v9, %v712_v10  ;;  %v705_v19 = vrot.slane %v694_v18, 7  ;;  %v713_v20 = vrot.slane %v694_v18, 6 }
 0x23d   : > { %v723_v14 = vrot.slane %v704_v11, 1  ;;  %v725_v15 = vrot.slane %v718_v12, 1 }
 0x23e   : > { %v706_v22 = vsel %vm521_vm1, %v702_v21, %v705_v19  ;;  %v719_v23 = vsel %vm521_vm1, %v705_v19, %v713_v20 }
 0x23f   : > { %v726_v16 = vsel %vm537_vm4, %v723_v14, %v725_v15  ;;  %v724_v17 = vsel %vm537_vm4, %v722_v13, %v723_v14  ;;  %v738_v25 = vrot.slane %v706_v22, 2  ;;  %v740_v26 = vrot.slane %v719_v23, 2 }
 0x240   : > { %729 = vrot.lane.b32.xlu1 %v726_v16, %s1108_s16  ;;  %727 = vrot.lane.b32.xlu0 %v724_v17, %s1108_s16 }
 0x241   : > { %v741_v33 = vsel %vm553_vm6, %v738_v25, %v740_v26  ;;  %v739_v34 = vsel %vm553_vm6, %v737_v27, %v738_v25 }
 0x2b2   : > { %v730_v28 = vpop.permute.xlu1 %729  ;;  %v728_v29 = vpop.permute.xlu0 %727 }
 0x2b3   : > { %v734_v30 = vadd.f32 %v730_v28, %v704_v11  ;;  %v733_v31 = vadd.f32 %v728_v29, %v716_v8 }
 0x2b5   : > { %v745_v35 = vadd.f32 %v741_v33, %v734_v30  ;;  %v744_v36 = vadd.f32 %v739_v34, %v733_v31 }
 0x2b7   : > { %v753_v37 = vadd.f32 %v1006_v32, %v745_v35  ;;  %v752_v38 = vadd.f32 %v1006_v32, %v744_v36 }
 0x2b9   : > { %v756_v39 = vmul.f32 0.01, %v752_v38  ;;  %vm754_vm8 = vcmp.ge.f32.partialorder %v752_v38, 0.0  ;;  %v757_v41 = vmul.f32 0.01, %v753_v37  ;;  %vm755_vm9 = vcmp.ge.f32.partialorder %v753_v37, 0.0 }
 0x2bb   : > { %v758_v40 = vsel %vm754_vm8, %v752_v38, %v756_v39  ;;  %v759_v42 = vsel %vm755_vm9, %v753_v37, %v757_v41 }
 0x2bc   : > { %1007 = vmatmul.mubr.msk.f32.vlgmr.msra.gmra.mxu1 %vm321_vm0, %v758_v40 }
 0x2bd   : > { %853 = vmatprep.mubr.f32.mxu1 %v1107_v0 }
 0x2c0   : > { %1008 = vmatmul.mubr.msk.f32.gmra.mxu1 %vm321_vm0, %v759_v42 }
 0x37c   : > { %v849_v43 = vpop.f32.mrf.mxu1 }
 0x37d   : > { %v864_v44 = vrot.slane %v849_v43, 7 }
 0x37e   : > { %v851_v45 = vpop.f32.mrf.mxu1 }
 0x37f   : > { %v879_v48 = vsel %vm521_vm1, %v849_v43, %v864_v44  ;;  %v865_v59 = vrot.slane %v851_v45, 7 }
 0x380   : > { %v855_v47 = vpop.f32.mrf.mxu1  ;;  %v885_v52 = vrot.slane %v879_v48, 1 }
 0x381   : > { %v866_v49 = vrot.slane %v855_v47, 7  ;;  %v875_v50 = vrot.slane %v855_v47, 6  ;;  %v880_v62 = vsel %vm521_vm1, %v851_v45, %v865_v59 }
 0x382   : > { %v857_v56 = vpop.f32.mrf.mxu1  ;;  %v900_v2 = vrot.slane %v880_v62, 2 }
 0x383   : > { %v867_v46 = vsel %vm521_vm1, %v864_v44, %v866_v49  ;;  %v881_v51 = vsel %vm521_vm1, %v866_v49, %v875_v50  ;;  %v868_v57 = vrot.slane %v857_v56, 7  ;;  %v876_v58 = vrot.slane %v857_v56, 6 }
 0x384   : > { %v886_v53 = vrot.slane %v867_v46, 1  ;;  %v888_v54 = vrot.slane %v881_v51, 1 }
 0x385   : > { %v869_v60 = vsel %vm521_vm1, %v865_v59, %v868_v57  ;;  %v882_v61 = vsel %vm521_vm1, %v868_v57, %v876_v58 }
 0x386   : > { %v889_v0 = vsel %vm537_vm4, %v886_v53, %v888_v54  ;;  %v887_v55 = vsel %vm537_vm4, %v885_v52, %v886_v53  ;;  %v901_v63 = vrot.slane %v869_v60, 2  ;;  %v903_v1 = vrot.slane %v882_v61, 2 }
 0x387   : > { %892 = vrot.lane.b32.xlu1 %v889_v0, %s1108_s16  ;;  %890 = vrot.lane.b32.xlu0 %v887_v55, %s1108_s16 }
 0x388   : > { %v904_v8 = vsel %vm553_vm6, %v901_v63, %v903_v1  ;;  %v902_v9 = vsel %vm553_vm6, %v900_v2, %v901_v63 }
 0x3f9   : > { %v893_v3 = vpop.permute.xlu1 %892  ;;  %v891_v4 = vpop.permute.xlu0 %890 }
 0x3fa   : > { %v897_v5 = vadd.f32 %v893_v3, %v867_v46  ;;  %v896_v6 = vadd.f32 %v891_v4, %v879_v48 }
 0x3fc   : > { %v908_v10 = vadd.f32 %v904_v8, %v897_v5  ;;  %v907_v11 = vadd.f32 %v902_v9, %v896_v6 }
 0x3fe   : > { %v916_v12 = vadd.f32 %v1009_v7, %v908_v10  ;;  %v915_v13 = vadd.f32 %v1009_v7, %v907_v11 }
 0x400   : > { %v918_v14 = vmax.f32 %v916_v12, 0.0  ;;  %v917_v15 = vmax.f32 %v915_v13, 0.0 }
 0x402   : > { %920 = vst.msk [vmem:[%s293_s28 + $0x8] sm:$0xff] %vm321_vm0, %v918_v14  ;;  %919 = vst.msk [vmem:[%s293_s28] sm:$0xff] %vm321_vm0, %v917_v15 }
 0x403 PF: > { %s18_s24 = sadd.s32 1, %s1102_s24  }
 0x404   : > { %p15_p1 = scmp.ge.s32.totalorder %s18_s24, 4  }
 0x406   :  { %17 = sbr.rel (!%p15_p1) target bundleno = 1 (0x1), region = 83 }
 0x40b   :  { %942 = vsyncpa [#allocation3], 1 }
 0x40c   :  { %944 = vsyncpa [#allocation3 + $0x1], 1 }

</bundles_post_ra>
